<compile_context>
chip_gen: v5e
topology: v5e:2x2
jax: 0.10.0
libtpu: 0.0.40
codegen_flags: <defaults>
</compile_context>

<pallas_src>
import jax
import jax.numpy as jnp
from jax.experimental import pallas as pl
from jax.experimental.pallas import tpu as pltpu


def dqn_kernel(x_ref, w1_ref, b1_ref, w2_ref, b2_ref, w3_ref, b3_ref, o_ref):
    # State arrives f32 (no wrapper-side cast op); cast to bf16 for the MXU here.
    x = x_ref[...].astype(w1_ref.dtype)
    # fc1 + ReLU  (bf16 operands -> f32 accumulate, epilogue in f32)
    h1 = jnp.dot(x, w1_ref[...], preferred_element_type=jnp.float32)
    h1 = jnp.maximum(h1 + b1_ref[...], 0.0)
    # fc2 + ReLU
    h2 = jnp.dot(h1.astype(w2_ref.dtype), w2_ref[...],
                 preferred_element_type=jnp.float32)
    h2 = jnp.maximum(h2 + b2_ref[...], 0.0)
    # fc3 (no activation) -> Q-values, written at their true width (no lane padding).
    q = jnp.dot(h2.astype(w3_ref.dtype), w3_ref[...],
                preferred_element_type=jnp.float32)
    o_ref[...] = (q + b3_ref[...]).astype(o_ref.dtype)


def _round_up(x, m):
    return ((x + m - 1) // m) * m


def _pad2(a, rows, cols):
    return jnp.pad(a, ((0, rows - a.shape[0]), (0, cols - a.shape[1])))


def prepare_params(w1, b1, w2, b2, w3, b3, *, compute_dtype=jnp.bfloat16):
    """One-time parameter prep (call at init, NOT per forward pass).

    Hidden dims are zero-padded to multiples of 128 lanes (mathematically inert:
    zero weight columns + zero biases -> ReLU(0) = 0, and the matching zero weight
    rows of the next layer ignore them). Input dim and n_actions stay unpadded.
    Weights go to bf16 (MXU operands), biases stay f32 (f32 VPU epilogue).
    """
    in_dim, fc1_dims = w1.shape
    fc2_dims = w2.shape[1]
    n_actions = w3.shape[1]
    h1_p = _round_up(fc1_dims, 128)
    h2_p = _round_up(fc2_dims, 128)

    w1_p = _pad2(w1, in_dim, h1_p).astype(compute_dtype)
    b1_p = _pad2(b1, 1, h1_p).astype(jnp.float32)
    w2_p = _pad2(w2, h1_p, h2_p).astype(compute_dtype)
    b2_p = _pad2(b2, 1, h2_p).astype(jnp.float32)
    w3_p = _pad2(w3, h2_p, n_actions).astype(compute_dtype)
    b3_p = b3.astype(jnp.float32)
    return (w1_p, b1_p, w2_p, b2_p, w3_p, b3_p)


def dqn_forward(state, padded_params, *, block_batch=None):
    """Pallas forward pass. state: (B, in_dim) f32, returns (B, n_actions) f32.

    padded_params must come from prepare_params() (padding/cast hoisted out of the
    hot path). By default the whole batch is a single grid step.
    """
    w1_p, b1_p, w2_p, b2_p, w3_p, b3_p = padded_params
    batch, in_dim = state.shape
    n_actions = w3_p.shape[1]

    if block_batch is None:
        # One grid step covering the whole batch (cap keeps per-step VMEM modest
        # even for unusually large batches; 2048 rows of activations ~ a few MiB).
        block_batch = min(_round_up(batch, 8), 2048)
    b_p = _round_up(batch, block_batch)

    x_in = state if b_p == batch else jnp.pad(state, ((0, b_p - batch), (0, 0)))

    grid = (b_p // block_batch,)

    # Weights/biases: full-array blocks, constant block index -> VMEM-resident
    # across every grid step (layers stay fused, no reduction grid axis).
    def weight_spec(shape):
        return pl.BlockSpec(shape, lambda i: (0, 0))

    q = pl.pallas_call(
        dqn_kernel,
        out_shape=jax.ShapeDtypeStruct((b_p, n_actions), jnp.float32),
        grid=grid,
        in_specs=[
            pl.BlockSpec((block_batch, in_dim), lambda i: (i, 0)),
            weight_spec(w1_p.shape), weight_spec(b1_p.shape),
            weight_spec(w2_p.shape), weight_spec(b2_p.shape),
            weight_spec(w3_p.shape), weight_spec(b3_p.shape),
        ],
        out_specs=pl.BlockSpec((block_batch, n_actions), lambda i: (i, 0)),
        compiler_params=pltpu.CompilerParams(
            dimension_semantics=("parallel",)),
    )(x_in, w1_p, b1_p, w2_p, b2_p, w3_p, b3_p)

    return q if b_p == batch else q[:batch]


def init_linear(key, in_dim, out_dim):
    """Deterministic init matching torch nn.Linear: U(-1/sqrt(in), 1/sqrt(in))."""
    kw, kb = jax.random.split(key)
    bound = 1.0 / (in_dim ** 0.5)
    w = jax.random.uniform(kw, (in_dim, out_dim), jnp.float32, -bound, bound)
    b = jax.random.uniform(kb, (1, out_dim), jnp.float32, -bound, bound)
    return w, b


def reference_forward(state, w1, b1, w2, b2, w3, b3):
    h1 = jnp.maximum(state @ w1 + b1, 0.0)
    h2 = jnp.maximum(h1 @ w2 + b2, 0.0)
    return h2 @ w3 + b3


if __name__ == "__main__":
    # DQN config: input_dims=(16,), fc1_dims=32, fc2_dims=32, n_actions=8.
    # Batch = 256 (small replay-buffer batch) -> a single 256-row grid step
    # (M=256 per dot, which also fills a full 256x256 MXU pass on v6e/v7x).
    batch, in_dim, fc1_dims, fc2_dims, n_actions = 256, 16, 32, 32, 8

    key = jax.random.PRNGKey(0)
    k_state, k1, k2, k3 = jax.random.split(key, 4)

    state = jax.random.normal(k_state, (batch, in_dim), jnp.float32)
    w1, b1 = init_linear(k1, in_dim, fc1_dims)
    w2, b2 = init_linear(k2, fc1_dims, fc2_dims)
    w3, b3 = init_linear(k3, fc2_dims, n_actions)

    # One-time parameter padding / bf16 cast (kept out of the per-call hot path).
    padded_params = prepare_params(w1, b1, w2, b2, w3, b3)
    padded_params = jax.block_until_ready(padded_params)

    q_vals = dqn_forward(state, padded_params)
    q_vals = jax.block_until_ready(q_vals)

    q_ref = reference_forward(state, w1, b1, w2, b2, w3, b3)
    assert q_vals.shape == (batch, n_actions)
    # bf16 MXU operands (f32 accumulate) -> small deviation vs the f32 reference.
    assert jnp.allclose(q_vals, q_ref, atol=2e-2, rtol=2e-2), float(
        jnp.max(jnp.abs(q_vals - q_ref)))

    print("KERNEL_OK")
</pallas_src>

<mosaic_0001>
module attributes {stable_mosaic.version = 11 : i64} {
  func.func @dqn_kernel(%arg0: i32, %arg1: memref<256x16xf32, #tpu.memory_space<vmem>>, %arg2: memref<16x128xbf16, #tpu.memory_space<vmem>>, %arg3: memref<1x128xf32, #tpu.memory_space<vmem>>, %arg4: memref<128x128xbf16, #tpu.memory_space<vmem>>, %arg5: memref<1x128xf32, #tpu.memory_space<vmem>>, %arg6: memref<128x8xbf16, #tpu.memory_space<vmem>>, %arg7: memref<1x8xf32, #tpu.memory_space<vmem>>, %arg8: memref<256x8xf32, #tpu.memory_space<vmem>>) attributes {dimension_semantics = [#tpu.dimension_semantics<parallel>], iteration_bounds = array<i64: 1>, scalar_prefetch = 0 : i64, scratch_operands = 0 : i64, tpu.core_type = #tpu.core_type<tc>, window_params = [{transform_indices = @transform_0, window_bounds = array<i64: 256, 16>}, {pipeline_mode = #tpu.pipeline_mode<synchronous>, transform_indices = @transform_1, window_bounds = array<i64: 16, 128>}, {pipeline_mode = #tpu.pipeline_mode<synchronous>, transform_indices = @transform_2, window_bounds = array<i64: 1, 128>}, {pipeline_mode = #tpu.pipeline_mode<synchronous>, transform_indices = @transform_3, window_bounds = array<i64: 128, 128>}, {pipeline_mode = #tpu.pipeline_mode<synchronous>, transform_indices = @transform_4, window_bounds = array<i64: 1, 128>}, {pipeline_mode = #tpu.pipeline_mode<synchronous>, transform_indices = @transform_5, window_bounds = array<i64: 128, 8>}, {pipeline_mode = #tpu.pipeline_mode<synchronous>, transform_indices = @transform_6, window_bounds = array<i64: 1, 8>}, {transform_indices = @transform_7, window_bounds = array<i64: 256, 8>}]} {
    %c0 = arith.constant 0 : index
    %c0_0 = arith.constant 0 : index
    %0 = vector.load %arg1[%c0, %c0_0] : memref<256x16xf32, #tpu.memory_space<vmem>>, vector<256x16xf32>
    %1 = arith.truncf %0 : vector<256x16xf32> to vector<256x16xbf16>
    %c0_1 = arith.constant 0 : index
    %c0_2 = arith.constant 0 : index
    %2 = vector.load %arg2[%c0_1, %c0_2] : memref<16x128xbf16, #tpu.memory_space<vmem>>, vector<16x128xbf16>
    %cst = arith.constant dense<0.000000e+00> : vector<256x128xf32>
    %3 = tpu.matmul %1, %2, %cst {dimension_numbers = #tpu.dot_dimension_numbers<[1], [0], [0], [1], [0, 0, 1, 1], [], []>} : vector<256x16xbf16>, vector<16x128xbf16>, vector<256x128xf32> -> vector<256x128xf32>
    %c0_3 = arith.constant 0 : index
    %c0_4 = arith.constant 0 : index
    %4 = vector.load %arg3[%c0_3, %c0_4] : memref<1x128xf32, #tpu.memory_space<vmem>>, vector<1x128xf32>
    %5 = vector.broadcast %4 : vector<1x128xf32> to vector<256x128xf32>
    %6 = arith.addf %3, %5 : vector<256x128xf32>
    %cst_5 = arith.constant 0.000000e+00 : f32
    %7 = vector.broadcast %cst_5 : f32 to vector<256x128xf32>
    %8 = arith.maximumf %6, %7 : vector<256x128xf32>
    %9 = arith.truncf %8 : vector<256x128xf32> to vector<256x128xbf16>
    %c0_6 = arith.constant 0 : index
    %c0_7 = arith.constant 0 : index
    %10 = vector.load %arg4[%c0_6, %c0_7] : memref<128x128xbf16, #tpu.memory_space<vmem>>, vector<128x128xbf16>
    %cst_8 = arith.constant dense<0.000000e+00> : vector<256x128xf32>
    %11 = tpu.matmul %9, %10, %cst_8 {dimension_numbers = #tpu.dot_dimension_numbers<[1], [0], [0], [1], [0, 0, 1, 1], [], []>} : vector<256x128xbf16>, vector<128x128xbf16>, vector<256x128xf32> -> vector<256x128xf32>
    %c0_9 = arith.constant 0 : index
    %c0_10 = arith.constant 0 : index
    %12 = vector.load %arg5[%c0_9, %c0_10] : memref<1x128xf32, #tpu.memory_space<vmem>>, vector<1x128xf32>
    %13 = vector.broadcast %12 : vector<1x128xf32> to vector<256x128xf32>
    %14 = arith.addf %11, %13 : vector<256x128xf32>
    %cst_11 = arith.constant 0.000000e+00 : f32
    %15 = vector.broadcast %cst_11 : f32 to vector<256x128xf32>
    %16 = arith.maximumf %14, %15 : vector<256x128xf32>
    %17 = arith.truncf %16 : vector<256x128xf32> to vector<256x128xbf16>
    %c0_12 = arith.constant 0 : index
    %c0_13 = arith.constant 0 : index
    %18 = vector.load %arg6[%c0_12, %c0_13] : memref<128x8xbf16, #tpu.memory_space<vmem>>, vector<128x8xbf16>
    %cst_14 = arith.constant dense<0.000000e+00> : vector<256x8xf32>
    %19 = tpu.matmul %17, %18, %cst_14 {dimension_numbers = #tpu.dot_dimension_numbers<[1], [0], [0], [1], [0, 0, 1, 1], [], []>} : vector<256x128xbf16>, vector<128x8xbf16>, vector<256x8xf32> -> vector<256x8xf32>
    %c0_15 = arith.constant 0 : index
    %c0_16 = arith.constant 0 : index
    %20 = vector.load %arg7[%c0_15, %c0_16] : memref<1x8xf32, #tpu.memory_space<vmem>>, vector<1x8xf32>
    %21 = vector.broadcast %20 : vector<1x8xf32> to vector<256x8xf32>
    %22 = arith.addf %19, %21 : vector<256x8xf32>
    %c0_17 = arith.constant 0 : index
    %c0_18 = arith.constant 0 : index
    %23 = vector.load %arg8[%c0_17, %c0_18] : memref<256x8xf32, #tpu.memory_space<vmem>>, vector<256x8xf32>
    tpu.vector_store %arg8[%c0_17, %c0_18], %22 {strides = array<i32>} : memref<256x8xf32, #tpu.memory_space<vmem>>, vector<256x8xf32>,
    return
  }
  func.func @transform_0(%arg0: i32) -> (i32, i32) {
    %c0_i32 = arith.constant 0 : i32
    %c0_i32_0 = arith.constant 0 : i32
    return %arg0, %c0_i32 : i32, i32
  }
  func.func @transform_1(%arg0: i32) -> (i32, i32) {
    %c0_i32 = arith.constant 0 : i32
    %c0_i32_0 = arith.constant 0 : i32
    %c0_i32_1 = arith.constant 0 : i32
    return %c0_i32, %c0_i32_0 : i32, i32
  }
  func.func @transform_2(%arg0: i32) -> (i32, i32) {
    %c0_i32 = arith.constant 0 : i32
    %c0_i32_0 = arith.constant 0 : i32
    %c0_i32_1 = arith.constant 0 : i32
    return %c0_i32, %c0_i32_0 : i32, i32
  }
  func.func @transform_3(%arg0: i32) -> (i32, i32) {
    %c0_i32 = arith.constant 0 : i32
    %c0_i32_0 = arith.constant 0 : i32
    %c0_i32_1 = arith.constant 0 : i32
    return %c0_i32, %c0_i32_0 : i32, i32
  }
  func.func @transform_4(%arg0: i32) -> (i32, i32) {
    %c0_i32 = arith.constant 0 : i32
    %c0_i32_0 = arith.constant 0 : i32
    %c0_i32_1 = arith.constant 0 : i32
    return %c0_i32, %c0_i32_0 : i32, i32
  }
  func.func @transform_5(%arg0: i32) -> (i32, i32) {
    %c0_i32 = arith.constant 0 : i32
    %c0_i32_0 = arith.constant 0 : i32
    %c0_i32_1 = arith.constant 0 : i32
    return %c0_i32, %c0_i32_0 : i32, i32
  }
  func.func @transform_6(%arg0: i32) -> (i32, i32) {
    %c0_i32 = arith.constant 0 : i32
    %c0_i32_0 = arith.constant 0 : i32
    %c0_i32_1 = arith.constant 0 : i32
    return %c0_i32, %c0_i32_0 : i32, i32
  }
  func.func @transform_7(%arg0: i32) -> (i32, i32) {
    %c0_i32 = arith.constant 0 : i32
    %c0_i32_0 = arith.constant 0 : i32
    return %arg0, %c0_i32 : i32, i32
  }
}

</mosaic_0001>

<bundles_post_ra>
// kernel: tpu_custom_call.1
= control target key start
LH: loop header
LB: loop body
LE: loop exit
PB: predicated region body
PF: predicated region fallthrough
CT: control target
= control target key end

     0   :  { %vm87_vm0 = vcmask 130048   ;;  %vm635_vm1 = vcmask 64512   ;;  %s1235_s1 = inlined_call_operand.vmem [shape: bf16[16,128], index: 1, kind: input, shape index: {}]   ;;  %s1236_s0 = inlined_call_operand.vmem [shape: f32[256,16], index: 0, kind: input, shape index: {}]   ;;  %s1237_s2 = inlined_call_operand.vmem [shape: f32[1,128], index: 2, kind: input, shape index: {}]   ;;  %s1238_s3 = inlined_call_operand.vmem [shape: bf16[128,128], index: 3, kind: input, shape index: {}]   ;;  %s1239_s4 = inlined_call_operand.vmem [shape: f32[1,128], index: 4, kind: input, shape index: {}]   ;;  %s1240_s5 = inlined_call_operand.vmem [shape: bf16[128,8], index: 5, kind: input, shape index: {}]   ;;  %s1241_s6 = inlined_call_operand.vmem [shape: f32[1,8], index: 6, kind: input, shape index: {}]   ;;  %s1242_s7 = inlined_call_operand.vmem [shape: f32[256,8], index: 7, kind: output, shape index: {}]  }
   0x1   :  { %v756_v0 = vld [vmem:[%s1235_s1] sm:$0xff]  ;;  %v28_v2 = vld [vmem:[%s1236_s0 + $0x8] sm:$0xff]  ;;  %v29_v4 = vld [vmem:[%s1236_s0 + $0x10] sm:$0xff] }
   0x2   :  { %v27_v1 = vld [vmem:[%s1236_s0] sm:$0xff]  ;;  %143 = vmatpush.bf16.msra.mxu0 %v756_v0  ;;  %773 = vmatpush.bf16.msra.mxu3 %v756_v0  ;;  %v30_v5 = vld [vmem:[%s1236_s0 + $0x18] sm:$0xff]  ;;  %v32_v8 = vld [vmem:[%s1236_s0 + $0x28] sm:$0xff] }
   0x3   :  { %v59_v3 = vpack.c.bf16 %v28_v2, %v27_v1  ;;  %v60_v6 = vpack.c.bf16 %v30_v5, %v29_v4  ;;  %v31_v7 = vld [vmem:[%s1236_s0 + $0x20] sm:$0xff]  ;;  %v33_v10 = vld [vmem:[%s1236_s0 + $0x30] sm:$0xff]  ;;  %v34_v11 = vld [vmem:[%s1236_s0 + $0x38] sm:$0xff] }
   0x4   :  { %v61_v9 = vpack.c.bf16 %v32_v8, %v31_v7  ;;  %v62_v12 = vpack.c.bf16 %v34_v11, %v33_v10  ;;  %v35_v13 = vld [vmem:[%s1236_s0 + $0x40] sm:$0xff]  ;;  %v36_v14 = vld [vmem:[%s1236_s0 + $0x48] sm:$0xff]  ;;  %v764_v16 = vld [vmem:[%s1238_s3 + $0x38] sm:$0xff] }
   0x5   :  { %676 = vmatmul.msk.bf16.vlgmr.msra.gmra.mxu0 %vm87_vm0, %v59_v3  ;;  %v63_v15 = vpack.c.bf16 %v36_v14, %v35_v13  ;;  %341 = vmatpush.bf16.msra.mxu1 %v764_v16  ;;  %v37_v17 = vld [vmem:[%s1236_s0 + $0x50] sm:$0xff]  ;;  %v38_v18 = vld [vmem:[%s1236_s0 + $0x58] sm:$0xff]  ;;  %v762_v21 = vld [vmem:[%s1238_s3 + $0x28] sm:$0xff] }
   0x6   :  { %774 = vmatpush.bf16.msrb.mxu3 %v764_v16  ;;  %v64_v19 = vpack.c.bf16 %v38_v18, %v37_v17  ;;  %v763_v20 = vld [vmem:[%s1238_s3 + $0x30] sm:$0xff]  ;;  %v761_v22 = vld [vmem:[%s1238_s3 + $0x20] sm:$0xff]  ;;  %v40_v24 = vld [vmem:[%s1236_s0 + $0x68] sm:$0xff] }
   0x7   :  { %v39_v23 = vld [vmem:[%s1236_s0 + $0x60] sm:$0xff]  ;;  %v760_v25 = vld [vmem:[%s1238_s3 + $0x18] sm:$0xff]  ;;  %v759_v27 = vld [vmem:[%s1238_s3 + $0x10] sm:$0xff] }
   0x8   :  { %v65_v26 = vpack.c.bf16 %v40_v24, %v39_v23  ;;  %v758_v28 = vld [vmem:[%s1238_s3 + $0x8] sm:$0xff]  ;;  %v757_v29 = vld [vmem:[%s1238_s3] sm:$0xff]  ;;  %v41_v30 = vld [vmem:[%s1236_s0 + $0x70] sm:$0xff] }
   0x9   :  { %342 = vmatpush.bf16.msra.mxu1 %v763_v20  ;;  %v42_v31 = vld [vmem:[%s1236_s0 + $0x78] sm:$0xff]  ;;  %v43_v33 = vld [vmem:[%s1236_s0 + $0x80] sm:$0xff]  ;;  %v44_v34 = vld [vmem:[%s1236_s0 + $0x88] sm:$0xff] }
   0xa   :  { %775 = vmatpush.bf16.msrb.mxu3 %v763_v20  ;;  %v66_v32 = vpack.c.bf16 %v42_v31, %v41_v30  ;;  %v67_v35 = vpack.c.bf16 %v44_v34, %v43_v33  ;;  %v925_v37 = vld [vmem:[%s1237_s2] ss:$0 sm:$0xff]  ;;  %v45_v43 = vld [vmem:[%s1236_s0 + $0x90] sm:$0xff]  ;;  %v46_v44 = vld [vmem:[%s1236_s0 + $0x98] sm:$0xff] }
   0xb   :  { %v68_v46 = vpack.c.bf16 %v46_v44, %v45_v43  ;;  %v47_v53 = vld [vmem:[%s1236_s0 + $0xa0] sm:$0xff]  ;;  %v48_v54 = vld [vmem:[%s1236_s0 + $0xa8] sm:$0xff]  ;;  %v53_v58 = vld [vmem:[%s1236_s0 + $0xd0] sm:$0xff] }
   0xc   :  { %v69_v56 = vpack.c.bf16 %v48_v54, %v47_v53  ;;  %v54_v59 = vld [vmem:[%s1236_s0 + $0xd8] sm:$0xff]  ;;  %v49_v2 = vld [vmem:[%s1236_s0 + $0xb0] sm:$0xff]  ;;  %v55_v7 = vld [vmem:[%s1236_s0 + $0xe0] sm:$0xff] }
   0xd   :  { %343 = vmatpush.bf16.msra.mxu1 %v762_v21  ;;  %v72_v60 = vpack.c.bf16 %v54_v59, %v53_v58  ;;  %v50_v3 = vld [vmem:[%s1236_s0 + $0xb8] sm:$0xff]  ;;  %v56_v8 = vld [vmem:[%s1236_s0 + $0xe8] sm:$0xff]  ;;  %v57_v20 = vld [vmem:[%s1236_s0 + $0xf0] sm:$0xff] }
   0xe   :  { %776 = vmatpush.bf16.msrb.mxu3 %v762_v21  ;;  %v70_v5 = vpack.c.bf16 %v50_v3, %v49_v2  ;;  %v52_v16 = vld [vmem:[%s1236_s0 + $0xc8] sm:$0xff]  ;;  %v58_v21 = vld [vmem:[%s1236_s0 + $0xf8] sm:$0xff]  ;;  %v1022_v3 = vld [vmem:[%s1239_s4] ss:$0 sm:$0xff] }
   0xf   :  { %689 = vmatmul.msk.bf16.vlgmr.msra.gmra.mxu3 %vm87_vm0, %v72_v60  ;;  %v772_v33 = vld [vmem:[%s1240_s5 + $0x38] sm:$0xff] }
  0x10   :  { %546 = vmatpush.bf16.msra.mxu2 %v772_v33 }
  0x11   :  { %344 = vmatpush.bf16.msra.mxu1 %v761_v22 }
  0x12   :  { %777 = vmatpush.bf16.msrb.mxu3 %v761_v22  ;;  %v74_v22 = vpack.c.bf16 %v58_v21, %v57_v20 }
  0x15   :  { %677 = vmatmul.msk.bf16.gmra.mxu0 %vm87_vm0, %v60_v6  ;;  %345 = vmatpush.bf16.msra.mxu1 %v760_v25 }
  0x16   :  { %778 = vmatpush.bf16.msrb.mxu3 %v760_v25 }
  0x19   :  { %346 = vmatpush.bf16.msra.mxu1 %v759_v27 }
  0x1a   :  { %779 = vmatpush.bf16.msrb.mxu3 %v759_v27 }
  0x1d   :  { %347 = vmatpush.bf16.msra.mxu1 %v758_v28 }
  0x1e   :  { %780 = vmatpush.bf16.msrb.mxu3 %v758_v28 }
  0x21   :  { %348 = vmatpush.bf16.msra.mxu1 %v757_v29 }
  0x22   :  { %781 = vmatpush.bf16.msrb.mxu3 %v757_v29 }
  0x25   :  { %678 = vmatmul.msk.bf16.gmra.mxu0 %vm87_vm0, %v61_v9  ;;  %v73_v9 = vpack.c.bf16 %v56_v8, %v55_v7 }
  0x26   :  { %782 = vmatpush.bf16.msra.mxu3 %v772_v33 }
  0x27   :  { %690 = vmatmul.msk.bf16.gmra.mxu3 %vm87_vm0, %v73_v9 }
  0x35   :  { %679 = vmatmul.msk.bf16.gmra.mxu0 %vm87_vm0, %v62_v12 }
  0x37   :  { %691 = vmatmul.msk.bf16.gmra.mxu3 %vm87_vm0, %v74_v22 }
  0x45   :  { %680 = vmatmul.msk.bf16.gmra.mxu0 %vm87_vm0, %v63_v15  ;;  %v51_v15 = vld [vmem:[%s1236_s0 + $0xc0] sm:$0xff] }
  0x46   :  { %v71_v18 = vpack.c.bf16 %v52_v16, %v51_v15 }
  0x55   :  { %681 = vmatmul.msk.bf16.gmra.mxu0 %vm87_vm0, %v64_v19 }
  0x65   :  { %682 = vmatmul.msk.bf16.gmra.mxu0 %vm87_vm0, %v65_v26 }
  0x75   :  { %683 = vmatmul.msk.bf16.gmra.mxu0 %vm87_vm0, %v66_v32 }
  0x82   :  { %v145_v36 = vpop.f32.mrf.mxu0 }
  0x83   :  { %v146_v38 = vadd.f32 %v925_v37, %v145_v36 }
  0x85   :  { %684 = vmatmul.msk.bf16.gmra.mxu0 %vm87_vm0, %v67_v35  ;;  %v225_v41 = vmax.f32 %v146_v38, 0.0  ;;  %v771_v38 = vld [vmem:[%s1240_s5 + $0x30] sm:$0xff] }
  0x86   :  { %547 = vmatpush.bf16.msra.mxu2 %v771_v38  ;;  %783 = vmatpush.bf16.msra.mxu3 %v771_v38 }
  0x8a   :  { %v147_v39 = vpop.f32.mrf.mxu0 }
  0x8b   :  { %v148_v40 = vadd.f32 %v925_v37, %v147_v39 }
  0x8d   :  { %v226_v42 = vmax.f32 %v148_v40, 0.0  ;;  %v770_v40 = vld [vmem:[%s1240_s5 + $0x28] sm:$0xff] }
  0x8e   :  { %548 = vmatpush.bf16.msra.mxu2 %v770_v40  ;;  %784 = vmatpush.bf16.msra.mxu3 %v770_v40 }
  0x8f   :  { %v257_v45 = vpack.c.bf16 %v226_v42, %v225_v41  ;;  %v769_v41 = vld [vmem:[%s1240_s5 + $0x20] sm:$0xff] }
  0x91   :  { %349 = vmatmul.bf16.vlgmr.msra.gmra.mxu1 %v257_v45  ;;  %v768_v45 = vld [vmem:[%s1240_s5 + $0x18] sm:$0xff] }
  0x92   :  { %v150_v47 = vpop.f32.mrf.mxu0  ;;  %549 = vmatpush.bf16.msra.mxu2 %v769_v41  ;;  %785 = vmatpush.bf16.msra.mxu3 %v769_v41 }
  0x93   :  { %v151_v48 = vadd.f32 %v925_v37, %v150_v47 }
  0x95   :  { %685 = vmatmul.msk.bf16.gmra.mxu0 %vm87_vm0, %v68_v46  ;;  %v227_v51 = vmax.f32 %v151_v48, 0.0 }
  0x96   :  { %550 = vmatpush.bf16.msra.mxu2 %v768_v45  ;;  %786 = vmatpush.bf16.msra.mxu3 %v768_v45 }
  0x9a   :  { %v152_v49 = vpop.f32.mrf.mxu0 }
  0x9b   :  { %v153_v50 = vadd.f32 %v925_v37, %v152_v49  ;;  %v767_v49 = vld [vmem:[%s1240_s5 + $0x10] sm:$0xff] }
  0x9c   :  { %551 = vmatpush.bf16.msra.mxu2 %v767_v49  ;;  %787 = vmatpush.bf16.msra.mxu3 %v767_v49 }
  0x9d   :  { %v228_v52 = vmax.f32 %v153_v50, 0.0 }
  0x9f   :  { %v258_v55 = vpack.c.bf16 %v228_v52, %v227_v51  ;;  %v766_v51 = vld [vmem:[%s1240_s5 + $0x8] sm:$0xff]  ;;  %v765_v52 = vld [vmem:[%s1240_s5] sm:$0xff] }
  0xa0   :  { %552 = vmatpush.bf16.msra.mxu2 %v766_v51  ;;  %788 = vmatpush.bf16.msra.mxu3 %v766_v51 }
  0xa1   :  { %354 = vmatmul.bf16.gmra.mxu1 %v258_v55 }
  0xa2   :  { %v155_v57 = vpop.f32.mrf.mxu0 }
  0xa3   :  { %v156_v61 = vadd.f32 %v925_v37, %v155_v57 }
  0xa4   :  { %553 = vmatpush.bf16.msra.mxu2 %v765_v52  ;;  %789 = vmatpush.bf16.msra.mxu3 %v765_v52 }
  0xa5   :  { %686 = vmatmul.msk.bf16.gmra.mxu0 %vm87_vm0, %v69_v56  ;;  %v229_v0 = vmax.f32 %v156_v61, 0.0 }
  0xaa   :  { %v157_v62 = vpop.f32.mrf.mxu0 }
  0xab   :  { %v158_v63 = vadd.f32 %v925_v37, %v157_v62 }
  0xad   :  { %v230_v1 = vmax.f32 %v158_v63, 0.0 }
  0xaf   :  { %v259_v4 = vpack.c.bf16 %v230_v1, %v229_v0 }
  0xb1   :  { %359 = vmatmul.bf16.gmra.mxu1 %v259_v4 }
  0xb2   :  { %v160_v6 = vpop.f32.mrf.mxu0 }
  0xb3   :  { %v161_v10 = vadd.f32 %v925_v37, %v160_v6 }
  0xb5   :  { %687 = vmatmul.msk.bf16.gmra.mxu0 %vm87_vm0, %v70_v5  ;;  %v231_v13 = vmax.f32 %v161_v10, 0.0 }
  0xba   :  { %v162_v11 = vpop.f32.mrf.mxu0 }
  0xbb   :  { %v163_v12 = vadd.f32 %v925_v37, %v162_v11 }
  0xbd   :  { %v232_v14 = vmax.f32 %v163_v12, 0.0 }
  0xbf   :  { %v260_v17 = vpack.c.bf16 %v232_v14, %v231_v13 }
  0xc1   :  { %364 = vmatmul.bf16.gmra.mxu1 %v260_v17 }
  0xc2   :  { %v165_v19 = vpop.f32.mrf.mxu0 }
  0xc3   :  { %v166_v23 = vadd.f32 %v925_v37, %v165_v19 }
  0xc5   :  { %688 = vmatmul.msk.bf16.gmra.mxu0 %vm87_vm0, %v71_v18  ;;  %v233_v26 = vmax.f32 %v166_v23, 0.0 }
  0xca   :  { %v167_v24 = vpop.f32.mrf.mxu0 }
  0xcb   :  { %v168_v25 = vadd.f32 %v925_v37, %v167_v24 }
  0xcd   :  { %v234_v27 = vmax.f32 %v168_v25, 0.0 }
  0xcf   :  { %v261_v28 = vpack.c.bf16 %v234_v27, %v233_v26 }
  0xd1   :  { %369 = vmatmul.bf16.gmra.mxu1 %v261_v28 }
  0xd2   :  { %v170_v29 = vpop.f32.mrf.mxu0 }
  0xd3   :  { %v171_v30 = vadd.f32 %v925_v37, %v170_v29 }
  0xd5   :  { %v235_v34 = vmax.f32 %v171_v30, 0.0 }
  0xda   :  { %v172_v31 = vpop.f32.mrf.mxu0 }
  0xdb   :  { %v173_v32 = vadd.f32 %v925_v37, %v172_v31 }
  0xdd   :  { %v236_v35 = vmax.f32 %v173_v32, 0.0 }
  0xdf   :  { %v262_v36 = vpack.c.bf16 %v236_v35, %v235_v34 }
  0xe1   :  { %374 = vmatmul.bf16.gmra.mxu1 %v262_v36 }
  0xe2   :  { %v175_v39 = vpop.f32.mrf.mxu0 }
  0xe3   :  { %v176_v42 = vadd.f32 %v925_v37, %v175_v39 }
  0xe5   :  { %v237_v46 = vmax.f32 %v176_v42, 0.0 }
  0xea   :  { %v177_v43 = vpop.f32.mrf.mxu0 }
  0xeb   :  { %v178_v44 = vadd.f32 %v925_v37, %v177_v43 }
  0xed   :  { %v238_v47 = vmax.f32 %v178_v44, 0.0 }
  0xef   :  { %v263_v48 = vpack.c.bf16 %v238_v47, %v237_v46 }
  0xf1   :  { %379 = vmatmul.bf16.gmra.mxu1 %v263_v48  ;;  %v210_v48 = vpop.f32.mrf.mxu3 }
  0xf2   :  { %v180_v50 = vpop.f32.mrf.mxu0 }
  0xf3   :  { %v181_v53 = vadd.f32 %v925_v37, %v180_v50 }
  0xf5   :  { %v239_v56 = vmax.f32 %v181_v53, 0.0 }
  0xfa   :  { %v182_v54 = vpop.f32.mrf.mxu0 }
  0xfb   :  { %v183_v55 = vadd.f32 %v925_v37, %v182_v54 }
  0xfd   :  { %v240_v57 = vmax.f32 %v183_v55, 0.0 }
  0xff   :  { %v264_v58 = vpack.c.bf16 %v240_v57, %v239_v56 }
 0x101   :  { %384 = vmatmul.bf16.gmra.mxu1 %v264_v58  ;;  %v212_v58 = vpop.f32.mrf.mxu3 }
 0x102   :  { %v185_v59 = vpop.f32.mrf.mxu0 }
 0x103   :  { %v186_v60 = vadd.f32 %v925_v37, %v185_v59 }
 0x105   :  { %v241_v63 = vmax.f32 %v186_v60, 0.0 }
 0x10a   :  { %v187_v61 = vpop.f32.mrf.mxu0 }
 0x10b   :  { %v188_v62 = vadd.f32 %v925_v37, %v187_v61 }
 0x10d   :  { %v242_v0 = vmax.f32 %v188_v62, 0.0 }
 0x10e   :  { %v350_v1 = vpop.f32.mrf.mxu1 }
 0x10f   :  { %v265_v2 = vpack.c.bf16 %v242_v0, %v241_v63  ;;  %v351_v5 = vadd.f32 %v1022_v3, %v350_v1  ;;  %v215_v1 = vpop.f32.mrf.mxu3 }
 0x111   :  { %389 = vmatmul.bf16.gmra.mxu1 %v265_v2  ;;  %v430_v8 = vmax.f32 %v351_v5, 0.0  ;;  %v211_v2 = vadd.f32 %v925_v37, %v210_v48 }
 0x112   :  { %v190_v4 = vpop.f32.mrf.mxu0 }
 0x113   :  { %v191_v9 = vadd.f32 %v925_v37, %v190_v4  ;;  %v213_v4 = vadd.f32 %v925_v37, %v212_v58 }
 0x115   :  { %v243_v14 = vmax.f32 %v191_v9, 0.0  ;;  %v252_v9 = vmax.f32 %v213_v4, 0.0 }
 0x116   :  { %v352_v6 = vpop.f32.mrf.mxu1 }
 0x117   :  { %v353_v7 = vadd.f32 %v1022_v3, %v352_v6 }
 0x119   :  { %v431_v10 = vmax.f32 %v353_v7, 0.0 }
 0x11a   :  { %v192_v11 = vpop.f32.mrf.mxu0 }
 0x11b   :  { %v193_v12 = vadd.f32 %v925_v37, %v192_v11  ;;  %v462_v13 = vpack.c.bf16 %v431_v10, %v430_v8  ;;  %v251_v8 = vmax.f32 %v211_v2, 0.0 }
 0x11d   :  { %v244_v15 = vmax.f32 %v193_v12, 0.0  ;;  %554 = vmatmul.bf16.vlgmr.msra.gmra.mxu2 %v462_v13  ;;  %v270_v12 = vpack.c.bf16 %v252_v9, %v251_v8  ;;  %v217_v13 = vpop.f32.mrf.mxu3 }
 0x11e   :  { %v355_v16 = vpop.f32.mrf.mxu1 }
 0x11f   :  { %v266_v17 = vpack.c.bf16 %v244_v15, %v243_v14  ;;  %v356_v19 = vadd.f32 %v1022_v3, %v355_v16  ;;  %v216_v16 = vadd.f32 %v925_v37, %v215_v1 }
 0x121   :  { %394 = vmatmul.bf16.gmra.mxu1 %v266_v17  ;;  %v432_v22 = vmax.f32 %v356_v19, 0.0  ;;  %v218_v17 = vadd.f32 %v925_v37, %v217_v13 }
 0x122   :  { %v195_v18 = vpop.f32.mrf.mxu0 }
 0x123   :  { %v196_v23 = vadd.f32 %v925_v37, %v195_v18 }
 0x125   :  { %v245_v28 = vmax.f32 %v196_v23, 0.0  ;;  %v254_v23 = vmax.f32 %v218_v17, 0.0 }
 0x126   :  { %v357_v20 = vpop.f32.mrf.mxu1 }
 0x127   :  { %v358_v21 = vadd.f32 %v1022_v3, %v357_v20 }
 0x129   :  { %v433_v24 = vmax.f32 %v358_v21, 0.0  ;;  %v220_v21 = vpop.f32.mrf.mxu3 }
 0x12a   :  { %v197_v25 = vpop.f32.mrf.mxu0 }
 0x12b   :  { %v198_v26 = vadd.f32 %v925_v37, %v197_v25  ;;  %v463_v27 = vpack.c.bf16 %v433_v24, %v432_v22  ;;  %v253_v22 = vmax.f32 %v216_v16, 0.0 }
 0x12d   :  { %v246_v29 = vmax.f32 %v198_v26, 0.0  ;;  %559 = vmatmul.bf16.gmra.mxu2 %v463_v27  ;;  %v271_v26 = vpack.c.bf16 %v254_v23, %v253_v22 }
 0x12e   :  { %v360_v30 = vpop.f32.mrf.mxu1 }
 0x12f   :  { %v267_v31 = vpack.c.bf16 %v246_v29, %v245_v28  ;;  %v361_v33 = vadd.f32 %v1022_v3, %v360_v30  ;;  %v221_v30 = vadd.f32 %v925_v37, %v220_v21 }
 0x131   :  { %399 = vmatmul.bf16.gmra.mxu1 %v267_v31  ;;  %v434_v36 = vmax.f32 %v361_v33, 0.0  ;;  %v222_v27 = vpop.f32.mrf.mxu3 }
 0x132   :  { %v200_v32 = vpop.f32.mrf.mxu0  ;;  %v223_v31 = vadd.f32 %v925_v37, %v222_v27 }
 0x133   :  { %v201_v38 = vadd.f32 %v925_v37, %v200_v32 }
 0x135   :  { %v247_v43 = vmax.f32 %v201_v38, 0.0 }
 0x136   :  { %v362_v34 = vpop.f32.mrf.mxu1 }
 0x137   :  { %v363_v35 = vadd.f32 %v1022_v3, %v362_v34 }
 0x139   :  { %v435_v39 = vmax.f32 %v363_v35, 0.0  ;;  %v255_v35 = vmax.f32 %v221_v30, 0.0 }
 0x13a   :  { %v202_v40 = vpop.f32.mrf.mxu0 }
 0x13b   :  { %v203_v41 = vadd.f32 %v925_v37, %v202_v40  ;;  %v464_v42 = vpack.c.bf16 %v435_v39, %v434_v36  ;;  %v256_v36 = vmax.f32 %v223_v31, 0.0 }
 0x13d   :  { %v248_v44 = vmax.f32 %v203_v41, 0.0  ;;  %564 = vmatmul.bf16.gmra.mxu2 %v464_v42  ;;  %v272_v40 = vpack.c.bf16 %v256_v36, %v255_v35 }
 0x13e   :  { %v365_v45 = vpop.f32.mrf.mxu1 }
 0x13f   :  { %v268_v46 = vpack.c.bf16 %v248_v44, %v247_v43  ;;  %v366_v49 = vadd.f32 %v1022_v3, %v365_v45 }
 0x141   :  { %404 = vmatmul.bf16.gmra.mxu1 %v268_v46  ;;  %v436_v52 = vmax.f32 %v366_v49, 0.0 }
 0x142   :  { %v205_v47 = vpop.f32.mrf.mxu0 }
 0x143   :  { %v206_v53 = vadd.f32 %v925_v37, %v205_v47 }
 0x145   :  { %v249_v59 = vmax.f32 %v206_v53, 0.0  ;;  %v1059_v53 = vld [vmem:[%s1241_s6] ss:$0 sm:$0xff] }
 0x146   :  { %v367_v50 = vpop.f32.mrf.mxu1 }
 0x147   :  { %v368_v51 = vadd.f32 %v1022_v3, %v367_v50 }
 0x149   :  { %v437_v54 = vmax.f32 %v368_v51, 0.0 }
 0x14a   :  { %v207_v55 = vpop.f32.mrf.mxu0 }
 0x14b   :  { %v208_v56 = vadd.f32 %v925_v37, %v207_v55  ;;  %v465_v57 = vpack.c.bf16 %v437_v54, %v436_v52 }
 0x14d   :  { %v250_v60 = vmax.f32 %v208_v56, 0.0  ;;  %569 = vmatmul.bf16.gmra.mxu2 %v465_v57 }
 0x14e   :  { %v370_v61 = vpop.f32.mrf.mxu1 }
 0x14f   :  { %v269_v62 = vpack.c.bf16 %v250_v60, %v249_v59  ;;  %v371_v63 = vadd.f32 %v1022_v3, %v370_v61 }
 0x151   :  { %409 = vmatmul.bf16.vlgmr.msrb.gmra.mxu3 %v269_v62  ;;  %v438_v6 = vmax.f32 %v371_v63, 0.0 }
 0x156   :  { %v372_v0 = vpop.f32.mrf.mxu1 }
 0x157   :  { %v373_v5 = vadd.f32 %v1022_v3, %v372_v0 }
 0x159   :  { %v439_v7 = vmax.f32 %v373_v5, 0.0 }
 0x15b   :  { %v466_v10 = vpack.c.bf16 %v439_v7, %v438_v6 }
 0x15d   :  { %574 = vmatmul.bf16.gmra.mxu2 %v466_v10 }
 0x15e   :  { %v375_v11 = vpop.f32.mrf.mxu1 }
 0x15f   :  { %v376_v14 = vadd.f32 %v1022_v3, %v375_v11 }
 0x161   :  { %414 = vmatmul.bf16.gmra.mxu3 %v270_v12  ;;  %v440_v19 = vmax.f32 %v376_v14, 0.0 }
 0x166   :  { %v377_v15 = vpop.f32.mrf.mxu1 }
 0x167   :  { %v378_v18 = vadd.f32 %v1022_v3, %v377_v15 }
 0x169   :  { %v441_v20 = vmax.f32 %v378_v18, 0.0 }
 0x16b   :  { %v467_v24 = vpack.c.bf16 %v441_v20, %v440_v19 }
 0x16d   :  { %579 = vmatmul.bf16.gmra.mxu2 %v467_v24 }
 0x16e   :  { %v380_v25 = vpop.f32.mrf.mxu1 }
 0x16f   :  { %v381_v28 = vadd.f32 %v1022_v3, %v380_v25 }
 0x171   :  { %419 = vmatmul.bf16.gmra.mxu3 %v271_v26  ;;  %v442_v33 = vmax.f32 %v381_v28, 0.0 }
 0x176   :  { %v382_v29 = vpop.f32.mrf.mxu1 }
 0x177   :  { %v383_v32 = vadd.f32 %v1022_v3, %v382_v29 }
 0x179   :  { %v443_v34 = vmax.f32 %v383_v32, 0.0 }
 0x17b   :  { %v468_v38 = vpack.c.bf16 %v443_v34, %v442_v33 }
 0x17d   :  { %584 = vmatmul.bf16.gmra.mxu2 %v468_v38 }
 0x17e   :  { %v385_v39 = vpop.f32.mrf.mxu1 }
 0x17f   :  { %v386_v41 = vadd.f32 %v1022_v3, %v385_v39 }
 0x181   :  { %424 = vmatmul.bf16.gmra.mxu3 %v272_v40  ;;  %v444_v44 = vmax.f32 %v386_v41, 0.0 }
 0x186   :  { %v387_v42 = vpop.f32.mrf.mxu1 }
 0x187   :  { %v388_v43 = vadd.f32 %v1022_v3, %v387_v42 }
 0x189   :  { %v445_v45 = vmax.f32 %v388_v43, 0.0 }
 0x18b   :  { %v469_v46 = vpack.c.bf16 %v445_v45, %v444_v44 }
 0x18d   :  { %589 = vmatmul.bf16.gmra.mxu2 %v469_v46 }
 0x18e   :  { %v390_v37 = vpop.f32.mrf.mxu1 }
 0x18f   :  { %v391_v47 = vadd.f32 %v1022_v3, %v390_v37 }
 0x191   :  { %v446_v50 = vmax.f32 %v391_v47, 0.0 }
 0x196   :  { %v392_v48 = vpop.f32.mrf.mxu1 }
 0x197   :  { %v393_v49 = vadd.f32 %v1022_v3, %v392_v48 }
 0x199   :  { %v447_v51 = vmax.f32 %v393_v49, 0.0 }
 0x19b   :  { %v470_v52 = vpack.c.bf16 %v447_v51, %v446_v50 }
 0x19d   :  { %594 = vmatmul.bf16.gmra.mxu2 %v470_v52 }
 0x19e   :  { %v395_v54 = vpop.f32.mrf.mxu1 }
 0x19f   :  { %v396_v57 = vadd.f32 %v1022_v3, %v395_v54 }
 0x1a0   :  { %v555_v55 = vpop.f32.mrf.mxu2 }
 0x1a1   :  { %v556_v56 = vadd.f32 %v1059_v53, %v555_v55  ;;  %v448_v61 = vmax.f32 %v396_v57, 0.0 }
 0x1a3   :  { %636 = vst.msk [vmem:[%s1242_s7] sm:$0xff] %vm635_vm1, %v556_v56 }
 0x1a6   :  { %v397_v58 = vpop.f32.mrf.mxu1 }
 0x1a7   :  { %v398_v59 = vadd.f32 %v1022_v3, %v397_v58 }
 0x1a8   :  { %v557_v60 = vpop.f32.mrf.mxu2 }
 0x1a9   :  { %v449_v62 = vmax.f32 %v398_v59, 0.0  ;;  %v558_v63 = vadd.f32 %v1059_v53, %v557_v60 }
 0x1ab   :  { %637 = vst.msk [vmem:[%s1242_s7 + $0x8] sm:$0xff] %vm635_vm1, %v558_v63  ;;  %v471_v0 = vpack.c.bf16 %v449_v62, %v448_v61 }
 0x1ad   :  { %599 = vmatmul.bf16.gmra.mxu2 %v471_v0 }
 0x1ae   :  { %v400_v1 = vpop.f32.mrf.mxu1 }
 0x1af   :  { %v401_v5 = vadd.f32 %v1022_v3, %v400_v1 }
 0x1b0   :  { %v560_v2 = vpop.f32.mrf.mxu2 }
 0x1b1   :  { %v561_v4 = vadd.f32 %v1059_v53, %v560_v2  ;;  %v450_v9 = vmax.f32 %v401_v5, 0.0 }
 0x1b3   :  { %638 = vst.msk [vmem:[%s1242_s7 + $0x10] sm:$0xff] %vm635_vm1, %v561_v4 }
 0x1b6   :  { %v402_v6 = vpop.f32.mrf.mxu1 }
 0x1b7   :  { %v403_v7 = vadd.f32 %v1022_v3, %v402_v6 }
 0x1b8   :  { %v562_v8 = vpop.f32.mrf.mxu2 }
 0x1b9   :  { %v451_v10 = vmax.f32 %v403_v7, 0.0  ;;  %v563_v11 = vadd.f32 %v1059_v53, %v562_v8 }
 0x1bb   :  { %639 = vst.msk [vmem:[%s1242_s7 + $0x18] sm:$0xff] %vm635_vm1, %v563_v11  ;;  %v472_v12 = vpack.c.bf16 %v451_v10, %v450_v9 }
 0x1bd   :  { %604 = vmatmul.bf16.gmra.mxu2 %v472_v12 }
 0x1be   :  { %v405_v13 = vpop.f32.mrf.mxu1 }
 0x1bf   :  { %v406_v16 = vadd.f32 %v1022_v3, %v405_v13 }
 0x1c0   :  { %v565_v14 = vpop.f32.mrf.mxu2 }
 0x1c1   :  { %v566_v15 = vadd.f32 %v1059_v53, %v565_v14  ;;  %v452_v20 = vmax.f32 %v406_v16, 0.0 }
 0x1c3   :  { %640 = vst.msk [vmem:[%s1242_s7 + $0x20] sm:$0xff] %vm635_vm1, %v566_v15 }
 0x1c6   :  { %v407_v17 = vpop.f32.mrf.mxu1 }
 0x1c7   :  { %v408_v18 = vadd.f32 %v1022_v3, %v407_v17 }
 0x1c8   :  { %v567_v19 = vpop.f32.mrf.mxu2 }
 0x1c9   :  { %v453_v21 = vmax.f32 %v408_v18, 0.0  ;;  %v568_v22 = vadd.f32 %v1059_v53, %v567_v19 }
 0x1cb   :  { %641 = vst.msk [vmem:[%s1242_s7 + $0x28] sm:$0xff] %vm635_vm1, %v568_v22  ;;  %v473_v23 = vpack.c.bf16 %v453_v21, %v452_v20 }
 0x1cd   :  { %609 = vmatmul.bf16.gmra.mxu2 %v473_v23 }
 0x1d0   :  { %v570_v24 = vpop.f32.mrf.mxu2 }
 0x1d1   :  { %v571_v25 = vadd.f32 %v1059_v53, %v570_v24 }
 0x1d3   :  { %642 = vst.msk [vmem:[%s1242_s7 + $0x30] sm:$0xff] %vm635_vm1, %v571_v25 }
 0x1d4   :  { %v410_v26 = vpop.f32.mrf.mxu3 }
 0x1d5   :  { %v411_v29 = vadd.f32 %v1022_v3, %v410_v26 }
 0x1d7   :  { %v454_v32 = vmax.f32 %v411_v29, 0.0 }
 0x1d8   :  { %v572_v27 = vpop.f32.mrf.mxu2 }
 0x1d9   :  { %v573_v28 = vadd.f32 %v1059_v53, %v572_v27 }
 0x1db   :  { %643 = vst.msk [vmem:[%s1242_s7 + $0x38] sm:$0xff] %vm635_vm1, %v573_v28 }
 0x1dc   :  { %v412_v30 = vpop.f32.mrf.mxu3 }
 0x1dd   :  { %v413_v31 = vadd.f32 %v1022_v3, %v412_v30 }
 0x1df   :  { %v455_v33 = vmax.f32 %v413_v31, 0.0 }
 0x1e0   :  { %v575_v34 = vpop.f32.mrf.mxu2 }
 0x1e1   :  { %v474_v35 = vpack.c.bf16 %v455_v33, %v454_v32  ;;  %v576_v36 = vadd.f32 %v1059_v53, %v575_v34 }
 0x1e3   :  { %644 = vst.msk [vmem:[%s1242_s7 + $0x40] sm:$0xff] %vm635_vm1, %v576_v36  ;;  %614 = vmatmul.bf16.vlgmr.msra.gmra.mxu3 %v474_v35 }
 0x1e4   :  { %v415_v38 = vpop.f32.mrf.mxu3 }
 0x1e5   :  { %v416_v41 = vadd.f32 %v1022_v3, %v415_v38 }
 0x1e7   :  { %v456_v44 = vmax.f32 %v416_v41, 0.0 }
 0x1e8   :  { %v577_v39 = vpop.f32.mrf.mxu2 }
 0x1e9   :  { %v578_v40 = vadd.f32 %v1059_v53, %v577_v39 }
 0x1eb   :  { %645 = vst.msk [vmem:[%s1242_s7 + $0x48] sm:$0xff] %vm635_vm1, %v578_v40 }
 0x1ec   :  { %v417_v42 = vpop.f32.mrf.mxu3 }
 0x1ed   :  { %v418_v43 = vadd.f32 %v1022_v3, %v417_v42 }
 0x1ef   :  { %v457_v45 = vmax.f32 %v418_v43, 0.0 }
 0x1f0   :  { %v580_v46 = vpop.f32.mrf.mxu2 }
 0x1f1   :  { %v581_v37 = vadd.f32 %v1059_v53, %v580_v46  ;;  %v475_v47 = vpack.c.bf16 %v457_v45, %v456_v44 }
 0x1f3   :  { %646 = vst.msk [vmem:[%s1242_s7 + $0x50] sm:$0xff] %vm635_vm1, %v581_v37  ;;  %619 = vmatmul.bf16.gmra.mxu3 %v475_v47 }
 0x1f4   :  { %v420_v48 = vpop.f32.mrf.mxu3 }
 0x1f5   :  { %v421_v51 = vadd.f32 %v1022_v3, %v420_v48 }
 0x1f7   :  { %v458_v55 = vmax.f32 %v421_v51, 0.0 }
 0x1f8   :  { %v582_v49 = vpop.f32.mrf.mxu2 }
 0x1f9   :  { %v583_v50 = vadd.f32 %v1059_v53, %v582_v49 }
 0x1fb   :  { %647 = vst.msk [vmem:[%s1242_s7 + $0x58] sm:$0xff] %vm635_vm1, %v583_v50 }
 0x1fc   :  { %v422_v52 = vpop.f32.mrf.mxu3 }
 0x1fd   :  { %v423_v54 = vadd.f32 %v1022_v3, %v422_v52 }
 0x1ff   :  { %v459_v56 = vmax.f32 %v423_v54, 0.0 }
 0x200   :  { %v585_v57 = vpop.f32.mrf.mxu2 }
 0x201   :  { %v586_v58 = vadd.f32 %v1059_v53, %v585_v57  ;;  %v476_v59 = vpack.c.bf16 %v459_v56, %v458_v55 }
 0x203   :  { %648 = vst.msk [vmem:[%s1242_s7 + $0x60] sm:$0xff] %vm635_vm1, %v586_v58  ;;  %624 = vmatmul.bf16.gmra.mxu3 %v476_v59 }
 0x204   :  { %v425_v60 = vpop.f32.mrf.mxu3 }
 0x205   :  { %v426_v63 = vadd.f32 %v1022_v3, %v425_v60 }
 0x207   :  { %v460_v2 = vmax.f32 %v426_v63, 0.0 }
 0x208   :  { %v587_v61 = vpop.f32.mrf.mxu2 }
 0x209   :  { %v588_v62 = vadd.f32 %v1059_v53, %v587_v61 }
 0x20b   :  { %649 = vst.msk [vmem:[%s1242_s7 + $0x68] sm:$0xff] %vm635_vm1, %v588_v62 }
 0x20c   :  { %v427_v0 = vpop.f32.mrf.mxu3 }
 0x20d   :  { %v428_v1 = vadd.f32 %v1022_v3, %v427_v0 }
 0x20f   :  { %v461_v4 = vmax.f32 %v428_v1, 0.0 }
 0x210   :  { %v590_v5 = vpop.f32.mrf.mxu2 }
 0x211   :  { %v591_v6 = vadd.f32 %v1059_v53, %v590_v5  ;;  %v477_v7 = vpack.c.bf16 %v461_v4, %v460_v2 }
 0x213   :  { %650 = vst.msk [vmem:[%s1242_s7 + $0x70] sm:$0xff] %vm635_vm1, %v591_v6  ;;  %629 = vmatmul.bf16.gmra.mxu3 %v477_v7 }
 0x218   :  { %v592_v8 = vpop.f32.mrf.mxu2 }
 0x219   :  { %v593_v9 = vadd.f32 %v1059_v53, %v592_v8 }
 0x21b   :  { %651 = vst.msk [vmem:[%s1242_s7 + $0x78] sm:$0xff] %vm635_vm1, %v593_v9 }
 0x220   :  { %v595_v3 = vpop.f32.mrf.mxu2 }
 0x221   :  { %v596_v10 = vadd.f32 %v1059_v53, %v595_v3 }
 0x223   :  { %652 = vst.msk [vmem:[%s1242_s7 + $0x80] sm:$0xff] %vm635_vm1, %v596_v10 }
 0x228   :  { %v597_v11 = vpop.f32.mrf.mxu2 }
 0x229   :  { %v598_v12 = vadd.f32 %v1059_v53, %v597_v11 }
 0x22b   :  { %653 = vst.msk [vmem:[%s1242_s7 + $0x88] sm:$0xff] %vm635_vm1, %v598_v12 }
 0x230   :  { %v600_v13 = vpop.f32.mrf.mxu2 }
 0x231   :  { %v601_v14 = vadd.f32 %v1059_v53, %v600_v13 }
 0x233   :  { %654 = vst.msk [vmem:[%s1242_s7 + $0x90] sm:$0xff] %vm635_vm1, %v601_v14 }
 0x238   :  { %v602_v15 = vpop.f32.mrf.mxu2 }
 0x239   :  { %v603_v16 = vadd.f32 %v1059_v53, %v602_v15 }
 0x23b   :  { %655 = vst.msk [vmem:[%s1242_s7 + $0x98] sm:$0xff] %vm635_vm1, %v603_v16 }
 0x240   :  { %v605_v17 = vpop.f32.mrf.mxu2 }
 0x241   :  { %v606_v18 = vadd.f32 %v1059_v53, %v605_v17 }
 0x243   :  { %656 = vst.msk [vmem:[%s1242_s7 + $0xa0] sm:$0xff] %vm635_vm1, %v606_v18 }
 0x248   :  { %v607_v19 = vpop.f32.mrf.mxu2 }
 0x249   :  { %v608_v20 = vadd.f32 %v1059_v53, %v607_v19 }
 0x24b   :  { %657 = vst.msk [vmem:[%s1242_s7 + $0xa8] sm:$0xff] %vm635_vm1, %v608_v20 }
 0x250   :  { %v610_v21 = vpop.f32.mrf.mxu2 }
 0x251   :  { %v611_v22 = vadd.f32 %v1059_v53, %v610_v21 }
 0x253   :  { %658 = vst.msk [vmem:[%s1242_s7 + $0xb0] sm:$0xff] %vm635_vm1, %v611_v22 }
 0x258   :  { %v612_v23 = vpop.f32.mrf.mxu2 }
 0x259   :  { %v613_v24 = vadd.f32 %v1059_v53, %v612_v23 }
 0x25b   :  { %659 = vst.msk [vmem:[%s1242_s7 + $0xb8] sm:$0xff] %vm635_vm1, %v613_v24 }
 0x266   :  { %v615_v25 = vpop.f32.mrf.mxu3 }
 0x267   :  { %v616_v26 = vadd.f32 %v1059_v53, %v615_v25 }
 0x269   :  { %660 = vst.msk [vmem:[%s1242_s7 + $0xc0] sm:$0xff] %vm635_vm1, %v616_v26 }
 0x26e   :  { %v617_v27 = vpop.f32.mrf.mxu3 }
 0x26f   :  { %v618_v28 = vadd.f32 %v1059_v53, %v617_v27 }
 0x271   :  { %661 = vst.msk [vmem:[%s1242_s7 + $0xc8] sm:$0xff] %vm635_vm1, %v618_v28 }
 0x276   :  { %v620_v29 = vpop.f32.mrf.mxu3 }
 0x277   :  { %v621_v30 = vadd.f32 %v1059_v53, %v620_v29 }
 0x279   :  { %662 = vst.msk [vmem:[%s1242_s7 + $0xd0] sm:$0xff] %vm635_vm1, %v621_v30 }
 0x27e   :  { %v622_v31 = vpop.f32.mrf.mxu3 }
 0x27f   :  { %v623_v32 = vadd.f32 %v1059_v53, %v622_v31 }
 0x281   :  { %663 = vst.msk [vmem:[%s1242_s7 + $0xd8] sm:$0xff] %vm635_vm1, %v623_v32 }
 0x286   :  { %v625_v33 = vpop.f32.mrf.mxu3 }
 0x287   :  { %v626_v34 = vadd.f32 %v1059_v53, %v625_v33 }
 0x289   :  { %664 = vst.msk [vmem:[%s1242_s7 + $0xe0] sm:$0xff] %vm635_vm1, %v626_v34 }
 0x28e   :  { %v627_v35 = vpop.f32.mrf.mxu3 }
 0x28f   :  { %v628_v36 = vadd.f32 %v1059_v53, %v627_v35 }
 0x291   :  { %665 = vst.msk [vmem:[%s1242_s7 + $0xe8] sm:$0xff] %vm635_vm1, %v628_v36 }
 0x296   :  { %v630_v38 = vpop.f32.mrf.mxu3 }
 0x297   :  { %v631_v39 = vadd.f32 %v1059_v53, %v630_v38 }
 0x299   :  { %666 = vst.msk [vmem:[%s1242_s7 + $0xf0] sm:$0xff] %vm635_vm1, %v631_v39 }
 0x29e   :  { %v632_v40 = vpop.f32.mrf.mxu3 }
 0x29f   :  { %v633_v41 = vadd.f32 %v1059_v53, %v632_v40 }
 0x2a1   :  { %667 = vst.msk [vmem:[%s1242_s7 + $0xf8] sm:$0xff] %vm635_vm1, %v633_v41 }

</bundles_post_ra>
